<compile_context>
chip_gen: v6e
topology: v6e:2x2x1
jax: 0.10.0
libtpu: 0.0.40
codegen_flags: <defaults>
</compile_context>

<pallas_src>
import functools

import jax
import jax.numpy as jnp
from jax.experimental import pallas as pl
from jax.experimental.pallas import tpu as pltpu


def _round_up(x, m):
    return ((x + m - 1) // m) * m


_TRIPLE_BLOCK = 4096        # triples per grid step (score_triples)
_ENTITY_TILE = 1024         # entity-axis tile (score-vs-all)
_QUERY_TILE = 512           # max query-row tile (score-vs-all)
_VMEM_LIMIT = 32 * 1024 * 1024   # safe on 64 MiB v7x and 128 MiB v5e/v6e


# ----------------------------------------------------------------------------
# Kernel 1: batched triple scoring (DistMult), TB triples per grid step.
# ----------------------------------------------------------------------------
def _distmult_block_kernel(h_ref, r_ref, t_ref, o_ref):
    # h/r/t: (TB, D) f32 blocks in VMEM; o: (1, TB) lane-dense score row.
    prod = h_ref[...] * r_ref[...] * t_ref[...]            # VPU elementwise
    d = prod.shape[-1]
    ones_row = jnp.ones((1, d), jnp.float32)
    # ones(1,D) contracted with prod over D on the MXU -> (1, TB): reduces over
    # D and lands the result already lane-dense (unmasked vst, no relayout).
    o_ref[...] = jax.lax.dot_general(
        ones_row, prod, (((1,), (1,)), ((), ())),
        preferred_element_type=jnp.float32)


def _score_triples_pallas(entity_emb, relation_emb, heads, relations, tails,
                          *, max_block=_TRIPLE_BLOCK):
    """heads/relations/tails: int [B]. Returns float32 [B] DistMult scores."""
    heads = jnp.asarray(heads, jnp.int32)
    relations = jnp.asarray(relations, jnp.int32)
    tails = jnp.asarray(tails, jnp.int32)

    B = heads.shape[0]
    D = entity_emb.shape[1]
    # Adaptive block: big (4096) for large batches, but do not over-pad tiny
    # batches.  Always a multiple of 128 (lane-dense output row block).
    block = min(max_block, _round_up(B, 128))
    num_blocks = pl.cdiv(B, block)
    B_pad = num_blocks * block
    pad = B_pad - B
    if pad:
        heads = jnp.pad(heads, (0, pad))
        relations = jnp.pad(relations, (0, pad))
        tails = jnp.pad(tails, (0, pad))

    # Gather in the wrapper into contiguous, pipelinable [B_pad, D] slabs.
    h_rows = jnp.take(entity_emb, heads, axis=0)
    r_rows = jnp.take(relation_emb, relations, axis=0)
    t_rows = jnp.take(entity_emb, tails, axis=0)

    out = pl.pallas_call(
        _distmult_block_kernel,
        grid_spec=pltpu.PrefetchScalarGridSpec(
            num_scalar_prefetch=0,
            grid=(num_blocks,),
            in_specs=[
                pl.BlockSpec((block, D), lambda i: (i, 0)),
                pl.BlockSpec((block, D), lambda i: (i, 0)),
                pl.BlockSpec((block, D), lambda i: (i, 0)),
            ],
            out_specs=pl.BlockSpec((1, block), lambda i: (0, i)),
        ),
        out_shape=jax.ShapeDtypeStruct((1, B_pad), jnp.float32),
        compiler_params=pltpu.CompilerParams(
            dimension_semantics=("parallel",),
            vmem_limit_bytes=_VMEM_LIMIT),
    )(h_rows, r_rows, t_rows)

    return out.reshape(B_pad)[:B]


# ----------------------------------------------------------------------------
# Kernel 2: score against all entities:  scores = q @ E_T  (E_T cached (D,N)).
# ----------------------------------------------------------------------------
def _score_all_kernel(q_ref, et_ref, o_ref):
    # q: (tm, D) bf16/f32 query rows (already h*r or r*t product)
    # et: (D, tn) entity-table tile (pre-transposed -> plain NN matmul, no vxpose)
    # o: (tm, tn) f32 scores
    o_ref[...] = jnp.dot(q_ref[...], et_ref[...],
                         preferred_element_type=jnp.float32)


def _score_all_pallas(q_rows, table_t, *, tn=_ENTITY_TILE):
    """q_rows: [M, D] (already the elementwise product); table_t: [D, N_pad].

    Returns [M, N_pad] f32 scores (caller slices the entity axis)."""
    M, D = q_rows.shape
    N_pad = table_t.shape[1]
    assert N_pad % tn == 0

    tm = min(_QUERY_TILE, _round_up(M, 8))
    M_pad = _round_up(M, tm)
    if M_pad != M:
        q_rows = jnp.pad(q_rows, ((0, M_pad - M), (0, 0)))

    out = pl.pallas_call(
        _score_all_kernel,
        grid_spec=pltpu.PrefetchScalarGridSpec(
            num_scalar_prefetch=0,
            # Entity axis LEADING so megacore (v7x) can shard it even when
            # M_pad // tm == 1; entity tile stays resident across the inner
            # (query) axis so the table is streamed exactly once per call.
            grid=(N_pad // tn, M_pad // tm),
            in_specs=[
                pl.BlockSpec((tm, D), lambda jn, im: (im, 0)),
                pl.BlockSpec((D, tn), lambda jn, im: (0, jn)),
            ],
            out_specs=pl.BlockSpec((tm, tn), lambda jn, im: (im, jn)),
        ),
        out_shape=jax.ShapeDtypeStruct((M_pad, N_pad), jnp.float32),
        compiler_params=pltpu.CompilerParams(
            dimension_semantics=("parallel", "parallel"),
            vmem_limit_bytes=_VMEM_LIMIT),
    )(q_rows, table_t)

    return out[:M]


# ----------------------------------------------------------------------------
# Kernel 3: candidate scoring:  scores[b, c] = q[b] . E[cand[b, c]]
# (avoids broadcasting the relation/anchor rows C times through HBM)
# ----------------------------------------------------------------------------
def _candidate_kernel(q_ref, c_ref, o_ref):
    # q: (1, 1, D); c: (1, tc, D); o: (1, 1, tc)
    q = q_ref[0]                                   # (1, D)
    c = c_ref[0]                                   # (tc, D)
    o_ref[0] = jax.lax.dot_general(
        q, c, (((1,), (1,)), ((), ())),
        preferred_element_type=jnp.float32)


def _score_candidates_pallas(q_rows, cand_rows):
    """q_rows: [B, D]; cand_rows: [B, C_pad, D]. Returns [B, C_pad] f32."""
    B, D = q_rows.shape
    C_pad = cand_rows.shape[1]
    tc = min(_ENTITY_TILE, C_pad)
    assert C_pad % tc == 0

    q3 = q_rows.reshape(B, 1, D)

    out = pl.pallas_call(
        _candidate_kernel,
        grid_spec=pltpu.PrefetchScalarGridSpec(
            num_scalar_prefetch=0,
            grid=(B, C_pad // tc),
            in_specs=[
                pl.BlockSpec((1, 1, D), lambda b, c: (b, 0, 0)),
                pl.BlockSpec((1, tc, D), lambda b, c: (b, c, 0)),
            ],
            out_specs=pl.BlockSpec((1, 1, tc), lambda b, c: (b, 0, c)),
        ),
        out_shape=jax.ShapeDtypeStruct((B, 1, C_pad), jnp.float32),
        compiler_params=pltpu.CompilerParams(
            dimension_semantics=("parallel", "parallel"),
            vmem_limit_bytes=_VMEM_LIMIT),
    )(q3, cand_rows)

    return out.reshape(B, C_pad)


# ----------------------------------------------------------------------------
# JAX/Pallas port of BaseKGEModel (DistMult instantiation).
# ----------------------------------------------------------------------------
class BaseKGEModelPallas:

    def __init__(self, num_entities, num_relations, embedding_dim,
                 regularization=1e-5, seed=0):
        self.num_entities = num_entities
        self.num_relations = num_relations
        self.embedding_dim = embedding_dim
        self.regularization = regularization
        # MXU compute dtype for the score-vs-all / candidate matmul paths.
        # bf16 halves the streamed entity-table traffic (mem-bound path) and
        # matches the bf16-oriented MXU on v6e/v7x; accumulation stays f32.
        self.mxu_dtype = jnp.bfloat16
        self._init_embeddings(seed)

    def _init_embeddings(self, seed):
        key = jax.random.PRNGKey(seed)
        k_e, k_r = jax.random.split(key)
        # xavier_uniform-style deterministic init
        bound_e = (6.0 / (self.num_entities + self.embedding_dim)) ** 0.5
        bound_r = (6.0 / (self.num_relations + self.embedding_dim)) ** 0.5
        self.entity_embeddings = jax.random.uniform(
            k_e, (self.num_entities, self.embedding_dim),
            minval=-bound_e, maxval=bound_e, dtype=jnp.float32)
        self.relation_embeddings = jax.random.uniform(
            k_r, (self.num_relations, self.embedding_dim),
            minval=-bound_r, maxval=bound_r, dtype=jnp.float32)
        self._refresh_scoring_cache()

    def _refresh_scoring_cache(self):
        # Cached once: zero-padded, bf16, transposed (D, N_pad) copy of the
        # entity table used by the score-vs-all kernel.  Avoids a full-table
        # pad/copy per score_heads/score_tails call.
        N, D = self.entity_embeddings.shape
        n_pad = _round_up(max(N, 1), _ENTITY_TILE)
        et = self.entity_embeddings.astype(self.mxu_dtype)
        et = jnp.pad(et, ((0, n_pad - N), (0, 0)))
        self._entity_table_t = jnp.transpose(et)      # (D, N_pad)

    # --- forward pass (hot path in Pallas) -------------------------------
    def score_triples(self, heads, relations, tails):
        return _score_triples_pallas(self.entity_embeddings,
                                     self.relation_embeddings,
                                     heads, relations, tails)

    def forward(self, triples):
        heads, relations, tails = triples[:, 0], triples[:, 1], triples[:, 2]
        return self.score_triples(heads, relations, tails)

    __call__ = forward

    # --- evaluation helpers ----------------------------------------------
    def _score_query_rows(self, q_rows, candidates):
        """q_rows: [B, D] f32 products. candidates: None or [B, C] indices."""
        q = q_rows.astype(self.mxu_dtype)
        if candidates is None:
            scores = _score_all_pallas(q, self._entity_table_t)
            return scores[:, :self.num_entities]
        candidates = jnp.asarray(candidates, jnp.int32)
        B, C = candidates.shape
        C_pad = _round_up(C, 128)
        if C_pad != C:
            candidates = jnp.pad(candidates, ((0, 0), (0, C_pad - C)))
        cand_rows = jnp.take(self.entity_embeddings,
                             candidates.reshape(-1), axis=0)
        cand_rows = cand_rows.reshape(B, C_pad,
                                      self.embedding_dim).astype(self.mxu_dtype)
        return _score_candidates_pallas(q, cand_rows)[:, :C]

    def score_heads(self, relations, tails, head_candidates=None):
        relations = jnp.asarray(relations, jnp.int32)
        tails = jnp.asarray(tails, jnp.int32)
        # scores[b, e] = sum_d E[e,d] * (R[r_b,d] * E[t_b,d])
        q = (jnp.take(self.relation_embeddings, relations, axis=0) *
             jnp.take(self.entity_embeddings, tails, axis=0))
        return self._score_query_rows(q, head_candidates)

    def score_tails(self, heads, relations, tail_candidates=None):
        heads = jnp.asarray(heads, jnp.int32)
        relations = jnp.asarray(relations, jnp.int32)
        q = (jnp.take(self.entity_embeddings, heads, axis=0) *
             jnp.take(self.relation_embeddings, relations, axis=0))
        return self._score_query_rows(q, tail_candidates)

    # --- misc utilities (plain JAX, not kernels) --------------------------
    def get_embeddings(self):
        return {"entities": self.entity_embeddings,
                "relations": self.relation_embeddings}

    def regularization_loss(self):
        ent = jnp.linalg.norm(self.entity_embeddings, ord=2, axis=1).mean()
        rel = jnp.linalg.norm(self.relation_embeddings, ord=2, axis=1).mean()
        return self.regularization * (ent + rel)

    def init_weights(self, init_method="xavier_uniform", seed=0):
        key = jax.random.PRNGKey(seed)
        k_e, k_r = jax.random.split(key)
        if init_method == "xavier_uniform":
            self._init_embeddings(seed)
            return
        if init_method == "normal":
            self.entity_embeddings = 0.1 * jax.random.normal(
                k_e, (self.num_entities, self.embedding_dim), jnp.float32)
            self.relation_embeddings = 0.1 * jax.random.normal(
                k_r, (self.num_relations, self.embedding_dim), jnp.float32)
        else:  # uniform
            self.entity_embeddings = jax.random.uniform(
                k_e, (self.num_entities, self.embedding_dim),
                minval=-0.1, maxval=0.1, dtype=jnp.float32)
            self.relation_embeddings = jax.random.uniform(
                k_r, (self.num_relations, self.embedding_dim),
                minval=-0.1, maxval=0.1, dtype=jnp.float32)
        self._refresh_scoring_cache()

    def get_model_size(self):
        return self.entity_embeddings.size + self.relation_embeddings.size
    # TODO(synk): save_embeddings/load_embeddings are host-side file I/O — no
    # Pallas equivalent; omitted.


# ----------------------------------------------------------------------------
# Self-test
# ----------------------------------------------------------------------------
if __name__ == "__main__":
    num_entities, num_relations, embedding_dim = 50, 10, 128
    batch, num_cand = 8, 12

    model = BaseKGEModelPallas(num_entities, num_relations, embedding_dim, seed=0)

    key = jax.random.PRNGKey(0)
    kh, kr, kt, kc = jax.random.split(key, 4)
    heads = jax.random.randint(kh, (batch,), 0, num_entities, dtype=jnp.int32)
    rels = jax.random.randint(kr, (batch,), 0, num_relations, dtype=jnp.int32)
    tails = jax.random.randint(kt, (batch,), 0, num_entities, dtype=jnp.int32)
    cands = jax.random.randint(kc, (batch, num_cand), 0, num_entities,
                               dtype=jnp.int32)
    triples = jnp.stack([heads, rels, tails], axis=1)  # [batch, 3]

    E, R = model.entity_embeddings, model.relation_embeddings

    # forward / score_triples (f32 path)
    scores = jax.block_until_ready(model(triples))
    ref = jnp.sum(E[heads] * R[rels] * E[tails], axis=-1)
    assert scores.shape == (batch,)
    assert scores.dtype == jnp.float32
    assert jnp.allclose(scores, ref, atol=5e-3, rtol=1e-2), (scores, ref)

    # score_tails against all entities (bf16 MXU matmul path)
    tail_scores = jax.block_until_ready(model.score_tails(heads, rels))
    ref_tails = (E[heads] * R[rels]) @ E.T
    assert tail_scores.shape == (batch, num_entities)
    assert jnp.allclose(tail_scores, ref_tails, atol=2e-2, rtol=3e-2)

    # score_heads against all entities (bf16 MXU matmul path)
    head_scores = jax.block_until_ready(model.score_heads(rels, tails))
    ref_heads = (R[rels] * E[tails]) @ E.T
    assert head_scores.shape == (batch, num_entities)
    assert jnp.allclose(head_scores, ref_heads, atol=2e-2, rtol=3e-2)

    # score_heads with explicit candidates (candidate kernel)
    cand_scores = jax.block_until_ready(model.score_heads(rels, tails, cands))
    ref_cand = jnp.einsum("bcd,bd->bc", E[cands], R[rels] * E[tails])
    assert cand_scores.shape == (batch, num_cand)
    assert jnp.allclose(cand_scores, ref_cand, atol=2e-2, rtol=3e-2)

    print("KERNEL_OK")
</pallas_src>

<mosaic_0001>
module attributes {stable_mosaic.version = 11 : i64} {
  func.func @_distmult_block_kernel(%arg0: i32, %arg1: memref<128x128xf32, #tpu.memory_space<vmem>>, %arg2: memref<128x128xf32, #tpu.memory_space<vmem>>, %arg3: memref<128x128xf32, #tpu.memory_space<vmem>>, %arg4: memref<1x128xf32, #tpu.memory_space<vmem>>) attributes {dimension_semantics = [#tpu.dimension_semantics<parallel>], iteration_bounds = array<i64: 1>, scalar_prefetch = 0 : i64, scratch_operands = 0 : i64, tpu.core_type = #tpu.core_type<tc>, window_params = [{transform_indices = @transform_0, window_bounds = array<i64: 128, 128>}, {transform_indices = @transform_1, window_bounds = array<i64: 128, 128>}, {transform_indices = @transform_2, window_bounds = array<i64: 128, 128>}, {transform_indices = @transform_3, window_bounds = array<i64: 1, 128>}]} {
    %c0 = arith.constant 0 : index
    %c0_0 = arith.constant 0 : index
    %0 = vector.load %arg1[%c0, %c0_0] : memref<128x128xf32, #tpu.memory_space<vmem>>, vector<128x128xf32>
    %c0_1 = arith.constant 0 : index
    %c0_2 = arith.constant 0 : index
    %1 = vector.load %arg2[%c0_1, %c0_2] : memref<128x128xf32, #tpu.memory_space<vmem>>, vector<128x128xf32>
    %2 = arith.mulf %0, %1 : vector<128x128xf32>
    %c0_3 = arith.constant 0 : index
    %c0_4 = arith.constant 0 : index
    %3 = vector.load %arg3[%c0_3, %c0_4] : memref<128x128xf32, #tpu.memory_space<vmem>>, vector<128x128xf32>
    %4 = arith.mulf %2, %3 : vector<128x128xf32>
    %cst = arith.constant 1.000000e+00 : f32
    %5 = vector.broadcast %cst : f32 to vector<1x128xf32>
    %cst_5 = arith.constant dense<0.000000e+00> : vector<1x128xf32>
    %6 = tpu.matmul %5, %4, %cst_5 {dimension_numbers = #tpu.dot_dimension_numbers<[1], [1], [0], [0], [0, 0, 1, 0], [], []>} : vector<1x128xf32>, vector<128x128xf32>, vector<1x128xf32> -> vector<1x128xf32>
    %c0_6 = arith.constant 0 : index
    %c0_7 = arith.constant 0 : index
    %7 = vector.load %arg4[%c0_6, %c0_7] : memref<1x128xf32, #tpu.memory_space<vmem>>, vector<1x128xf32>
    tpu.vector_store %arg4[%c0_6, %c0_7], %6 {strides = array<i32>} : memref<1x128xf32, #tpu.memory_space<vmem>>, vector<1x128xf32>,
    return
  }
  func.func @transform_0(%arg0: i32) -> (i32, i32) {
    %c0_i32 = arith.constant 0 : i32
    %c0_i32_0 = arith.constant 0 : i32
    return %arg0, %c0_i32 : i32, i32
  }
  func.func @transform_1(%arg0: i32) -> (i32, i32) {
    %c0_i32 = arith.constant 0 : i32
    %c0_i32_0 = arith.constant 0 : i32
    return %arg0, %c0_i32 : i32, i32
  }
  func.func @transform_2(%arg0: i32) -> (i32, i32) {
    %c0_i32 = arith.constant 0 : i32
    %c0_i32_0 = arith.constant 0 : i32
    return %arg0, %c0_i32 : i32, i32
  }
  func.func @transform_3(%arg0: i32) -> (i32, i32) {
    %c0_i32 = arith.constant 0 : i32
    %c0_i32_0 = arith.constant 0 : i32
    return %c0_i32, %arg0 : i32, i32
  }
}

</mosaic_0001>

<bundles_post_ra>
// kernel: tpu_custom_call.1
= control target key start
LH: loop header
LB: loop body
LE: loop exit
PB: predicated region body
PF: predicated region fallthrough
CT: control target
= control target key end

     0   :  { %8 = vsyncpa [#allocation3], 0  ;;  %s428_s0 = inlined_call_operand.hbm [shape: f32[128,128], index: 0, kind: input, shape index: {}]   ;;  %s429_s1 = inlined_call_operand.hbm [shape: f32[128,128], index: 1, kind: input, shape index: {}]   ;;  %s430_s2 = inlined_call_operand.hbm [shape: f32[128,128], index: 2, kind: input, shape index: {}]   ;;  %s431_s3 = inlined_call_operand.hbm [shape: f32[1,128], index: 3, kind: output, shape index: {}]  }
   0x1   :  { %9 = vsyncpa [#allocation6], 0 }
   0x2   :  { %10 = vsyncpa [#allocation4], 0  ;;  %s370_s12 = smov [#allocation5]   ;;  %s371_s14 = smov [#allocation2]  }
   0x3   :  { %s28_s13 = sshll.u32 %s370_s12, 4  ;;  %s16_s15 = sshll.u32 %s371_s14, 4  ;;  %s29_s13 = int_to_ptr.vmem [resolvable:$true] %s28_s13  ;;  %s17_s15 = int_to_ptr.vmem [resolvable:$true] %s16_s15 }
   0x4   :  { %s292_s16 = scalar_lea.vmem %s29_s13, 2048  ;;  %p297_p1 = scmp.lt.s32.totalorder %s29_s13, %s29_s13 }
   0x5   :  { %p293_p0 = scmp.ne.s32.totalorder %s29_s13, %s292_s16  ;;  %p298_p2 = scmp.lt.s32.totalorder %s292_s16, %s292_s16 }
   0x7   :  { %p299_p3 = por %p298_p2, %p297_p1 }
   0x9   :  { %p300_p4 = pnand %p299_p3, %p293_p0 }
   0xb   :  { %303 = shalt.err (!%p300_p4)
}
   0xc   :  { %s372_s17 = smov 128   ;;  %s373_s18 = smov 8  }
   0xd   :  { %34 = dma.hbm_to_vmem [thread:$0]  %s429_s1, 2048, %s29_s13, [#allocation6], %s372_s17, %s372_s17, %s373_s18  }
   0xe   :  { %s312_s21 = scalar_lea.vmem %s17_s15, 2048  ;;  %p317_p6 = scmp.lt.s32.totalorder %s17_s15, %s17_s15 }
   0xf   :  { %p313_p5 = scmp.ne.s32.totalorder %s17_s15, %s312_s21  ;;  %p318_p7 = scmp.lt.s32.totalorder %s312_s21, %s312_s21 }
  0x11   :  { %p319_p8 = por %p318_p7, %p317_p6 }
  0x13   :  { %p320_p9 = pnand %p319_p8, %p313_p5 }
  0x15   :  { %323 = shalt.err (!%p320_p9)
}
  0x16   :  { %22 = dma.hbm_to_vmem [thread:$0]  %s428_s0, 2048, %s17_s15, [#allocation3], %s372_s17, %s372_s17, %s373_s18  }
  0x17   :  { %s374_s24 = smov [#allocation7]  }
  0x18   :  { %s40_s25 = sshll.u32 %s374_s24, 4  ;;  %s41_s25 = int_to_ptr.vmem [resolvable:$true] %s40_s25 }
  0x19   :  { %s332_s26 = scalar_lea.vmem %s41_s25, 2048  ;;  %p337_p11 = scmp.lt.s32.totalorder %s41_s25, %s41_s25 }
  0x1a   :  { %p333_p10 = scmp.ne.s32.totalorder %s41_s25, %s332_s26  ;;  %p338_p12 = scmp.lt.s32.totalorder %s332_s26, %s332_s26 }
  0x1c   :  { %p339_p13 = por %p338_p12, %p337_p11 }
  0x1e   :  { %p340_p0 = pnand %p339_p13, %p333_p10 }
  0x20   :  { %343 = shalt.err (!%p340_p0)
}
  0x21   :  { %46 = dma.hbm_to_vmem [thread:$0]  %s430_s2, 2048, %s41_s25, [#allocation6], %s372_s17, %s372_s17, %s373_s18  }
  0x22   :  { %364 = dma.done.wait [#allocation3], 2048  }
  0x23   :  { %365 = vsyncadd [#allocation3], 4294965248 }
  0x24   :  { %366 = dma.done.wait [#allocation6], 4096  }
  0x25   :  { %367 = vsyncadd [#allocation6], 4294963200  ;;  %v375_v0 = vmov 0.0   ;;  %vm376_vm0 = vmmov 0   ;;  %v71_v1 = vld [vmem:[#allocation2 + $0x78] sm:$0xff]  ;;  %v70_v5 = vld [vmem:[#allocation2 + $0x70] sm:$0xff] }
  0x26   :  { %240 = vmatprep.subr.mxu0 %v375_v0  ;;  %272 = vmatprep.mubr.msk.f32.mxu0 %vm376_vm0, %v375_v0  ;;  %v87_v2 = vld [vmem:[#allocation5 + $0x78] sm:$0xff]  ;;  %v86_v6 = vld [vmem:[#allocation5 + $0x70] sm:$0xff]  ;;  %v69_v9 = vld [vmem:[#allocation2 + $0x68] sm:$0xff]  ;;  %s378_s0 = smov [#allocation8]  }
  0x27   :  { %v119_v3 = vld [vmem:[#allocation7 + $0x78] sm:$0xff]  ;;  %v103_v4 = vmul.f32 %v87_v2, %v71_v1  ;;  %v102_v7 = vmul.f32 %v86_v6, %v70_v5  ;;  %v118_v8 = vld [vmem:[#allocation7 + $0x70] sm:$0xff]  ;;  %v85_v10 = vld [vmem:[#allocation5 + $0x68] sm:$0xff]  ;;  %s213_s2 = sshll.u32 %s378_s0, 4  ;;  %s214_s2 = int_to_ptr.vmem [resolvable:$true] %s213_s2 }
  0x28   :  { %v101_v13 = vmul.f32 %v85_v10, %v69_v9  ;;  %v117_v14 = vld [vmem:[#allocation7 + $0x68] sm:$0xff]  ;;  %v68_v15 = vld [vmem:[#allocation2 + $0x60] sm:$0xff]  ;;  %v67_v20 = vld [vmem:[#allocation2 + $0x58] sm:$0xff]  ;;  %s344_s28 = scalar_lea.vmem %s214_s2, 16  ;;  %s348_s29 = scalar_lea.vmem %s214_s2, 32 }
  0x29   :  { %v135_v11 = vmul.f32 %v119_v3, %v103_v4  ;;  %v134_v12 = vmul.f32 %v118_v8, %v102_v7  ;;  %v84_v16 = vld [vmem:[#allocation5 + $0x60] sm:$0xff]  ;;  %v83_v21 = vld [vmem:[#allocation5 + $0x58] sm:$0xff]  ;;  %v66_v25 = vld [vmem:[#allocation2 + $0x50] sm:$0xff]  ;;  %p345_p1 = scmp.ne.s32.totalorder %s214_s2, %s344_s28  ;;  %p349_p2 = scmp.lt.s32.totalorder %s214_s2, %s214_s2 }
  0x2a   :  { %v133_v17 = vmul.f32 %v117_v14, %v101_v13  ;;  %v100_v18 = vmul.f32 %v84_v16, %v68_v15  ;;  %v116_v19 = vld [vmem:[#allocation7 + $0x60] sm:$0xff]  ;;  %v99_v23 = vmul.f32 %v83_v21, %v67_v20  ;;  %v115_v24 = vld [vmem:[#allocation7 + $0x58] sm:$0xff]  ;;  %v82_v26 = vld [vmem:[#allocation5 + $0x50] sm:$0xff]  ;;  %p350_p3 = scmp.lt.s32.totalorder %s348_s29, %s344_s28 }
  0x2b   :  { %241 = vmatpush3.xpose.msra.mxu0 %v135_v11  ;;  %v98_v28 = vmul.f32 %v82_v26, %v66_v25  ;;  %v114_v29 = vld [vmem:[#allocation7 + $0x50] sm:$0xff]  ;;  %v65_v30 = vld [vmem:[#allocation2 + $0x48] sm:$0xff]  ;;  %v64_v35 = vld [vmem:[#allocation2 + $0x40] sm:$0xff] }
  0x2c   :  { %242 = vmatprep.subr.mxu0 %v375_v0  ;;  %v132_v22 = vmul.f32 %v116_v19, %v100_v18  ;;  %v131_v27 = vmul.f32 %v115_v24, %v99_v23  ;;  %v81_v31 = vld [vmem:[#allocation5 + $0x48] sm:$0xff]  ;;  %v80_v36 = vld [vmem:[#allocation5 + $0x40] sm:$0xff]  ;;  %v63_v40 = vld [vmem:[#allocation2 + $0x38] sm:$0xff]  ;;  %v377_v18 = vmov 1.0   ;;  %p351_p4 = por %p350_p3, %p349_p2 }
  0x2d   :  { %v130_v32 = vmul.f32 %v114_v29, %v98_v28  ;;  %v97_v33 = vmul.f32 %v81_v31, %v65_v30  ;;  %v113_v34 = vld [vmem:[#allocation7 + $0x48] sm:$0xff]  ;;  %v96_v38 = vmul.f32 %v80_v36, %v64_v35  ;;  %v112_v39 = vld [vmem:[#allocation7 + $0x40] sm:$0xff]  ;;  %v79_v41 = vld [vmem:[#allocation5 + $0x38] sm:$0xff] }
  0x2e   :  { %v95_v43 = vmul.f32 %v79_v41, %v63_v40  ;;  %v111_v44 = vld [vmem:[#allocation7 + $0x38] sm:$0xff]  ;;  %v62_v45 = vld [vmem:[#allocation2 + $0x30] sm:$0xff]  ;;  %v61_v50 = vld [vmem:[#allocation2 + $0x28] sm:$0xff]  ;;  %p352_p5 = pnand %p351_p4, %p345_p1 }
  0x2f   :  { %243 = vmatpush3.xpose.msra.mxu0 %v134_v12  ;;  %v129_v37 = vmul.f32 %v113_v34, %v97_v33  ;;  %v128_v42 = vmul.f32 %v112_v39, %v96_v38  ;;  %v78_v46 = vld [vmem:[#allocation5 + $0x30] sm:$0xff]  ;;  %v77_v51 = vld [vmem:[#allocation5 + $0x28] sm:$0xff]  ;;  %v60_v55 = vld [vmem:[#allocation2 + $0x20] sm:$0xff] }
  0x30   :  { %244 = vmatprep.subr.mxu0 %v375_v0  ;;  %v127_v47 = vmul.f32 %v111_v44, %v95_v43  ;;  %v94_v48 = vmul.f32 %v78_v46, %v62_v45  ;;  %v110_v49 = vld [vmem:[#allocation7 + $0x30] sm:$0xff]  ;;  %v93_v53 = vmul.f32 %v77_v51, %v61_v50  ;;  %v109_v54 = vld [vmem:[#allocation7 + $0x28] sm:$0xff]  ;;  %v76_v56 = vld [vmem:[#allocation5 + $0x20] sm:$0xff] }
  0x31   :  { %v92_v58 = vmul.f32 %v76_v56, %v60_v55  ;;  %v108_v59 = vld [vmem:[#allocation7 + $0x20] sm:$0xff]  ;;  %v59_v60 = vld [vmem:[#allocation2 + $0x18] sm:$0xff]  ;;  %v58_v2 = vld [vmem:[#allocation2 + $0x10] sm:$0xff] }
  0x32   :  { %v126_v52 = vmul.f32 %v110_v49, %v94_v48  ;;  %v125_v57 = vmul.f32 %v109_v54, %v93_v53  ;;  %v75_v61 = vld [vmem:[#allocation5 + $0x18] sm:$0xff]  ;;  %v74_v3 = vld [vmem:[#allocation5 + $0x10] sm:$0xff]  ;;  %v57_v7 = vld [vmem:[#allocation2 + $0x8] sm:$0xff] }
  0x33   :  { %245 = vmatpush3.xpose.msra.mxu0 %v133_v17  ;;  %v124_v62 = vmul.f32 %v108_v59, %v92_v58  ;;  %v91_v63 = vmul.f32 %v75_v61, %v59_v60  ;;  %v107_v1 = vld [vmem:[#allocation7 + $0x18] sm:$0xff]  ;;  %v90_v5 = vmul.f32 %v74_v3, %v58_v2  ;;  %v106_v6 = vld [vmem:[#allocation7 + $0x10] sm:$0xff]  ;;  %v73_v8 = vld [vmem:[#allocation5 + $0x8] sm:$0xff] }
  0x34   :  { %246 = vmatprep.subr.mxu0 %v375_v0  ;;  %v89_v10 = vmul.f32 %v73_v8, %v57_v7  ;;  %v105_v11 = vld [vmem:[#allocation7 + $0x8] sm:$0xff]  ;;  %v56_v12 = vld [vmem:[#allocation2] sm:$0xff] }
  0x35   :  { %v123_v4 = vmul.f32 %v107_v1, %v91_v63  ;;  %v122_v9 = vmul.f32 %v106_v6, %v90_v5  ;;  %v72_v13 = vld [vmem:[#allocation5] sm:$0xff] }
  0x36   :  { %v121_v14 = vmul.f32 %v105_v11, %v89_v10  ;;  %v88_v15 = vmul.f32 %v72_v13, %v56_v12  ;;  %v104_v16 = vld [vmem:[#allocation7] sm:$0xff] }
  0x37   :  { %247 = vmatpush3.xpose.msra.mxu0 %v132_v22 }
  0x38   :  { %248 = vmatprep.subr.mxu0 %v375_v0  ;;  %v120_v17 = vmul.f32 %v104_v16, %v88_v15 }
  0x3b   :  { %249 = vmatpush3.xpose.msra.mxu0 %v131_v27 }
  0x3c   :  { %250 = vmatprep.subr.mxu0 %v375_v0 }
  0x3f   :  { %251 = vmatpush3.xpose.msra.mxu0 %v130_v32 }
  0x40   :  { %252 = vmatprep.subr.mxu0 %v375_v0 }
  0x43   :  { %253 = vmatpush3.xpose.msra.mxu0 %v129_v37 }
  0x44   :  { %254 = vmatprep.subr.mxu0 %v375_v0 }
  0x47   :  { %255 = vmatpush3.xpose.msra.mxu0 %v128_v42 }
  0x48   :  { %256 = vmatprep.subr.mxu0 %v375_v0 }
  0x4b   :  { %257 = vmatpush3.xpose.msra.mxu0 %v127_v47 }
  0x4c   :  { %258 = vmatprep.subr.mxu0 %v375_v0 }
  0x4f   :  { %259 = vmatpush3.xpose.msra.mxu0 %v126_v52 }
  0x50   :  { %260 = vmatprep.subr.mxu0 %v375_v0 }
  0x53   :  { %261 = vmatpush3.xpose.msra.mxu0 %v125_v57 }
  0x54   :  { %262 = vmatprep.subr.mxu0 %v375_v0 }
  0x57   :  { %263 = vmatpush3.xpose.msra.mxu0 %v124_v62 }
  0x58   :  { %264 = vmatprep.subr.mxu0 %v375_v0 }
  0x5b   :  { %265 = vmatpush3.xpose.msra.mxu0 %v123_v4 }
  0x5c   :  { %266 = vmatprep.subr.mxu0 %v375_v0 }
  0x5f   :  { %267 = vmatpush3.xpose.msra.mxu0 %v122_v9 }
  0x60   :  { %268 = vmatprep.subr.mxu0 %v375_v0 }
  0x63   :  { %269 = vmatpush3.xpose.msra.mxu0 %v121_v14 }
  0x64   :  { %270 = vmatprep.subr.mxu0 %v375_v0 }
  0x67   :  { %271 = vmatpush3.xpose.msra.mxu0 %v120_v17 }
  0x6a   :  { %273 = vmatmul.mubr.f32.vlgmr.msra.gmra.mxu0 %v377_v18 }
 0x12a   :  { %v202_v19 = vpop.f32.mrf.mxu0 }
 0x12b   :  { %206 = vst [vmem:[#allocation8] sm:$0x1] %v202_v19 }
 0x12c   :  { %v274_v20 = vpop.f32.mrf.mxu0 }
 0x12d   :  { %355 = shalt.err (!%p352_p5)
}
 0x12e   :  { %216 = dma.vmem_to_hbm [thread:$0]  %s214_s2, 16, %s431_s3, [#allocation4]  }
 0x12f   :  { %368 = dma.done.wait [#allocation4], 16  }
 0x130   :  { %369 = vsyncadd [#allocation4], 4294967280 }
 0x131   :  { %220 = vsyncpa [#allocation3], 1 }
 0x132   :  { %221 = vsyncpa [#allocation6], 1 }
 0x133   :  { %222 = vsyncpa [#allocation4], 1 }

</bundles_post_ra>
